<compile_context>
chip_gen: v7x
topology: tpu7x:2x2x1
jax: 0.10.0
libtpu: 0.0.40
codegen_flags: <defaults>
</compile_context>

<pallas_src>
import functools

import jax
import jax.numpy as jnp
from jax.experimental import pallas as pl
from jax.experimental.pallas import tpu as pltpu


_MAX_TILE_M = 1024                 # rows of the im2col matrix per grid step
_VMEM_LIMIT = 32 * 1024 * 1024     # portable budget (v7x has 64 MiB physical)
_LANES = 128
_NEG_BIG = -1.0e30                 # bias for padded output channels


def _round_up(x, m):
    return ((x + m - 1) // m) * m


def _apply_activation(x, name, *, inside_kernel=False):
    """Activation in f32. Shared by Pallas kernels and the JAX reference."""
    if name == "relu":
        return jnp.maximum(x, 0.0)
    if name == "tanh":
        return jnp.tanh(x)
    if name == "Sigmoid":
        return jax.nn.sigmoid(x)
    if name == "Softmax":  # PyTorch Softmax(dim=1) == channel axis == last axis here
        m = jnp.max(x, axis=-1, keepdims=True)
        e = jnp.exp(x - m)
        s = jnp.sum(e, axis=-1, keepdims=True)
        if inside_kernel:
            return e * pl.reciprocal(s, approx=True)   # divide on the EUP slot
        return e / s
    if name == "none":
        return x
    raise ValueError(f"unsupported activation: {name}")


# --------------------------- Pallas kernels ----------------------------------

def _conv_matmul_kernel(x_ref, w_ref, b_ref, o_ref, *, activation):
    """(tile_m, K)bf16 @ (K, N)bf16 -> f32 acc, + bias, + activation, fused."""
    acc = jnp.dot(x_ref[...], w_ref[...], preferred_element_type=jnp.float32)
    acc = acc + b_ref[...]
    acc = _apply_activation(acc, activation, inside_kernel=True)
    o_ref[...] = acc.astype(o_ref.dtype)


def _choose_tile_m(M, K, N, out_itemsize):
    # >= 2 grid steps so both v7x TensorCores get work on small layers.
    tile_m = min(_MAX_TILE_M, _round_up(max(pl.cdiv(M, 2), 1), 8))
    # Keep double-buffered LHS/out tiles + weights/bias under the VMEM budget.
    fixed = 2 * (K * N * 2 + N * 4)
    per_row = 2 * (K * 2 + N * out_itemsize)
    budget = int(0.75 * _VMEM_LIMIT)
    if fixed + per_row * tile_m > budget:
        tile_m = max(8, ((budget - fixed) // per_row) // 8 * 8)
    return tile_m


def conv_matmul_bias_act(patches, w_mat, b_row, activation,
                         out_dtype=jnp.bfloat16):
    """M-tiled (M,K)@(K,N) + bias + activation as one pipelined Pallas call.

    patches: (M, K) bf16 im2col rows (K padded to 128);
    w_mat: (K, N) bf16 (N padded to 128); b_row: (1, N) f32.
    """
    M, K = patches.shape
    K2, N = w_mat.shape
    assert K == K2 and K % _LANES == 0 and N % _LANES == 0

    out_itemsize = jnp.dtype(out_dtype).itemsize
    tile_m = _choose_tile_m(M, K, N, out_itemsize)
    grid_m = pl.cdiv(M, tile_m)            # partial last block clipped by Pallas

    transc = M * N if activation in ("tanh", "Sigmoid", "Softmax") else 0
    cost = pl.CostEstimate(
        flops=2 * M * K * N,
        transcendentals=int(transc),
        bytes_accessed=int(M * K * 2 + K * N * 2 + N * 4 + M * N * out_itemsize),
    )

    kernel = functools.partial(_conv_matmul_kernel, activation=activation)
    return pl.pallas_call(
        kernel,
        out_shape=jax.ShapeDtypeStruct((M, N), out_dtype),
        grid=(grid_m,),
        in_specs=[
            pl.BlockSpec((tile_m, K), lambda i: (i, 0)),   # row tile, pipelined
            pl.BlockSpec((K, N), lambda i: (0, 0)),        # weights VMEM-resident
            pl.BlockSpec((1, N), lambda i: (0, 0)),        # bias VMEM-resident
        ],
        out_specs=pl.BlockSpec((tile_m, N), lambda i: (i, 0)),
        compiler_params=pltpu.CompilerParams(
            dimension_semantics=("parallel",),             # megacore shard on v7x
            vmem_limit_bytes=_VMEM_LIMIT,
        ),
        cost_estimate=cost,
    )(patches, w_mat, b_row)


# --------------------------- Instance norm (tiled over HW) -------------------

def _in_stats_kernel(x_ref, sum_ref, ssq_ref):
    @pl.when(pl.program_id(1) == 0)
    def _():
        sum_ref[...] = jnp.zeros_like(sum_ref)
        ssq_ref[...] = jnp.zeros_like(ssq_ref)
    x = x_ref[...].astype(jnp.float32)                     # (1, thw, C)
    sum_ref[...] += jnp.sum(x, axis=1, keepdims=True)
    ssq_ref[...] += jnp.sum(x * x, axis=1, keepdims=True)


def _in_apply_kernel(x_ref, sum_ref, ssq_ref, o_ref, *, inv_hw, eps, activation):
    x = x_ref[...].astype(jnp.float32)                     # (1, thw, C)
    mean = sum_ref[...] * inv_hw
    var = ssq_ref[...] * inv_hw - mean * mean
    y = (x - mean) * jax.lax.rsqrt(var + eps)
    y = _apply_activation(y, activation, inside_kernel=True)
    o_ref[...] = y.astype(o_ref.dtype)


def _pick_hw_tile(hw, max_rows=2048):
    if hw <= max_rows:
        return hw
    for t in range(max_rows - max_rows % 8, 7, -8):        # multiples of 8
        if hw % t == 0:
            return t
    # TODO(synk): pad/mask the HW axis instead of falling back to an un-tiled block.
    return hw


def instance_norm_act(x_nhwc, activation, eps=1e-5):
    """InstanceNorm2d (affine=False) + activation, tiled over HW, bf16 I/O."""
    B, H, W, C = x_nhwc.shape
    hw = H * W
    x_flat = x_nhwc.reshape(B, hw, C)
    thw = _pick_hw_tile(hw)
    n_t = hw // thw

    sums, ssqs = pl.pallas_call(
        _in_stats_kernel,
        out_shape=(jax.ShapeDtypeStruct((B, 1, C), jnp.float32),
                   jax.ShapeDtypeStruct((B, 1, C), jnp.float32)),
        grid=(B, n_t),
        in_specs=[pl.BlockSpec((1, thw, C), lambda b, t: (b, t, 0))],
        out_specs=(pl.BlockSpec((1, 1, C), lambda b, t: (b, 0, 0)),
                   pl.BlockSpec((1, 1, C), lambda b, t: (b, 0, 0))),
        compiler_params=pltpu.CompilerParams(
            dimension_semantics=("parallel", "arbitrary"),
            vmem_limit_bytes=_VMEM_LIMIT,
        ),
    )(x_flat)

    kernel = functools.partial(_in_apply_kernel, inv_hw=1.0 / hw, eps=eps,
                               activation=activation)
    out = pl.pallas_call(
        kernel,
        out_shape=jax.ShapeDtypeStruct((B, hw, C), x_nhwc.dtype),
        grid=(B, n_t),
        in_specs=[pl.BlockSpec((1, thw, C), lambda b, t: (b, t, 0)),
                  pl.BlockSpec((1, 1, C), lambda b, t: (b, 0, 0)),
                  pl.BlockSpec((1, 1, C), lambda b, t: (b, 0, 0))],
        out_specs=pl.BlockSpec((1, thw, C), lambda b, t: (b, t, 0)),
        compiler_params=pltpu.CompilerParams(
            dimension_semantics=("parallel", "parallel"),
            vmem_limit_bytes=_VMEM_LIMIT,
        ),
    )(x_flat, sums, ssqs)
    return out.reshape(B, H, W, C)


# --------------------------- ConvBlock ----------------------------------------

def prepare_conv_params(w_oihw, b):
    """One-time weight prep.

    (Cout,Cin,kh,kw) -> (K_pad, N_pad) bf16 with K = kh*kw*Cin and both K and N
    padded to multiples of 128 (zero weight rows/cols). Padded bias columns are
    set to -1e30 so a fused Softmax ignores them.  Returns (w_mat, b_row, cout).
    """
    cout, cin, kh, kw = w_oihw.shape
    K = kh * kw * cin
    Kp = _round_up(K, _LANES)
    Np = _round_up(cout, _LANES)
    w_mat = jnp.transpose(w_oihw, (2, 3, 1, 0)).reshape(K, cout)
    w_mat = jnp.pad(w_mat, ((0, Kp - K), (0, Np - cout)))
    b_row = jnp.pad(b.reshape(1, cout).astype(jnp.float32),
                    ((0, 0), (0, Np - cout)), constant_values=_NEG_BIG)
    return w_mat.astype(jnp.bfloat16), b_row, cout


def conv_block_forward_nhwc(x_nhwc, params, *, kernel_size, stride, padding=0,
                            padtype="zero", norm="none", activation="relu"):
    """ConvBlock.forward in NHWC / bf16 (chain blocks in this layout)."""
    w_mat, b_row, cout = params
    kh = kw = int(kernel_size)
    Kp, Np = w_mat.shape

    x = x_nhwc.astype(jnp.bfloat16)                        # bf16 intermediates
    if padding > 0:
        if padtype == "reflection":
            x = jnp.pad(x, ((0, 0), (padding, padding), (padding, padding), (0, 0)),
                        mode="reflect")
        elif padtype == "zero":
            x = jnp.pad(x, ((0, 0), (padding, padding), (padding, padding), (0, 0)))
        else:
            raise ValueError("Wrong choice of padding type!")

    B, Hp, Wp, cin = x.shape
    K = kh * kw * cin
    assert Kp == _round_up(K, _LANES), (Kp, K)
    Ho = (Hp - kh) // stride + 1
    Wo = (Wp - kw) // stride + 1

    # im2col: tap-major (di, dj), channel-minor — matches w_mat row ordering.
    # TODO(synk): replace with in-kernel halo DMA + per-tap accumulation.
    cols = []
    for di in range(kh):
        for dj in range(kw):
            cols.append(x[:, di:di + stride * Ho:stride,
                          dj:dj + stride * Wo:stride, :])
    if Kp > K:                                             # K alignment pad
        cols.append(jnp.zeros((B, Ho, Wo, Kp - K), x.dtype))
    patches = jnp.concatenate(cols, axis=-1).reshape(B * Ho * Wo, Kp)

    if norm in ("none", "sn"):
        fused_act = activation
    elif norm == "instance":
        fused_act = "none"
    else:
        # TODO(synk): batch norm (running stats) and AdaIN (externally-assigned
        # weight/bias) are stateful; not implemented in this stateless kernel.
        raise NotImplementedError(f"norm={norm} not implemented")

    out = conv_matmul_bias_act(patches, w_mat, b_row, fused_act)   # (M, Np) bf16
    out = out[:, :cout].reshape(B, Ho, Wo, cout)

    if norm == "instance":
        out = instance_norm_act(out, activation)
    return out


def conv_block_forward(x_nchw, params, **kwargs):
    """PyTorch-layout wrapper: NCHW in / NCHW out (transpose only at boundary)."""
    y = conv_block_forward_nhwc(jnp.transpose(x_nchw, (0, 2, 3, 1)), params, **kwargs)
    return jnp.transpose(y, (0, 3, 1, 2))


# --------------------------- Pure-JAX reference --------------------------------

def reference_conv_block(x_nchw, w_oihw, b, *, kernel_size, stride, padding,
                         padtype, norm, activation):
    del kernel_size
    x = jnp.transpose(x_nchw, (0, 2, 3, 1)).astype(jnp.float32)
    if padding > 0:
        mode = "reflect" if padtype == "reflection" else "constant"
        x = jnp.pad(x, ((0, 0), (padding, padding), (padding, padding), (0, 0)),
                    mode=mode)
    w_hwio = jnp.transpose(w_oihw, (2, 3, 1, 0)).astype(jnp.float32)
    y = jax.lax.conv_general_dilated(
        x, w_hwio, window_strides=(stride, stride), padding="VALID",
        dimension_numbers=("NHWC", "HWIO", "NHWC"))
    y = y + b.reshape(1, 1, 1, -1)
    if norm == "instance":
        mean = jnp.mean(y, axis=(1, 2), keepdims=True)
        var = jnp.var(y, axis=(1, 2), keepdims=True)
        y = (y - mean) / jnp.sqrt(var + 1e-5)
    y = _apply_activation(y, activation)
    return jnp.transpose(y, (0, 3, 1, 2))


# --------------------------- Main ----------------------------------------------

if __name__ == "__main__":
    key = jax.random.PRNGKey(0)
    B, Cin, S = 2, 4, 16
    kx, kp = jax.random.split(key)
    x = jax.random.normal(kx, (B, Cin, S, S), jnp.float32)

    # Three ConvBlock configurations exercising reflection/zero pad, stride 1/2,
    # relu/tanh activations, none/instance norm (chained like in the generator).
    configs = [
        dict(cout=16,  kernel_size=7, stride=1, padding=3,
             padtype="reflection", norm="none",     activation="relu"),
        dict(cout=128, kernel_size=4, stride=2, padding=1,
             padtype="zero",       norm="none",     activation="tanh"),
        dict(cout=64,  kernel_size=3, stride=1, padding=1,
             padtype="zero",       norm="instance", activation="relu"),
    ]

    cur_nhwc = jnp.transpose(x, (0, 2, 3, 1))   # model-boundary transpose only
    cur_cin = Cin
    keys = jax.random.split(kp, 2 * len(configs))
    for i, cfg in enumerate(configs):
        cout, k = cfg["cout"], cfg["kernel_size"]
        fan_in = cur_cin * k * k
        w = jax.random.normal(keys[2 * i], (cout, cur_cin, k, k),
                              jnp.float32) / jnp.sqrt(jnp.float32(fan_in))
        b = 0.01 * jax.random.normal(keys[2 * i + 1], (cout,), jnp.float32)

        params = prepare_conv_params(w, b)                  # one-time layout prep
        block = jax.jit(functools.partial(
            conv_block_forward_nhwc, params=params,
            kernel_size=cfg["kernel_size"], stride=cfg["stride"],
            padding=cfg["padding"], padtype=cfg["padtype"],
            norm=cfg["norm"], activation=cfg["activation"]))

        out_nhwc = block(cur_nhwc)
        jax.block_until_ready(out_nhwc)

        # Reference gets the identical (bf16-exact) input, in f32 NCHW.
        ref_in = jnp.transpose(cur_nhwc, (0, 3, 1, 2)).astype(jnp.float32)
        ref = reference_conv_block(
            ref_in, w, b, kernel_size=cfg["kernel_size"], stride=cfg["stride"],
            padding=cfg["padding"], padtype=cfg["padtype"],
            norm=cfg["norm"], activation=cfg["activation"])

        out_nchw = jnp.transpose(out_nhwc, (0, 3, 1, 2)).astype(jnp.float32)
        assert out_nchw.shape == ref.shape, (out_nchw.shape, ref.shape)
        assert jnp.all(jnp.isfinite(out_nchw))
        # bf16 MXU inputs + bf16 intermediates => ~1e-2 relative error vs f32 ref.
        assert jnp.allclose(out_nchw, ref, atol=5e-2, rtol=5e-2), (
            f"block {i}: max|diff|={float(jnp.max(jnp.abs(out_nchw - ref)))}")

        cur_nhwc = out_nhwc
        cur_cin = cout

    final = jnp.transpose(cur_nhwc, (0, 3, 1, 2))           # model-boundary NCHW
    assert final.shape == (B, 64, 8, 8), final.shape
    print("KERNEL_OK")
</pallas_src>

<mosaic_0001>
module attributes {stable_mosaic.version = 11 : i64} {
  func.func @_conv_matmul_kernel(%arg0: i32, %arg1: memref<256x256xbf16, #tpu.memory_space<vmem>>, %arg2: memref<256x128xbf16, #tpu.memory_space<vmem>>, %arg3: memref<1x128xf32, #tpu.memory_space<vmem>>, %arg4: memref<256x128xbf16, #tpu.memory_space<vmem>>) attributes {dimension_semantics = [#tpu.dimension_semantics<parallel>], iteration_bounds = array<i64: 2>, scalar_prefetch = 0 : i64, scratch_operands = 0 : i64, tpu.core_type = #tpu.core_type<tc>, window_params = [{transform_indices = @transform_0, window_bounds = array<i64: 256, 256>}, {pipeline_mode = #tpu.pipeline_mode<synchronous>, transform_indices = @transform_1, window_bounds = array<i64: 256, 128>}, {pipeline_mode = #tpu.pipeline_mode<synchronous>, transform_indices = @transform_2, window_bounds = array<i64: 1, 128>}, {transform_indices = @transform_3, window_bounds = array<i64: 256, 128>}]} {
    %c0 = arith.constant 0 : index
    %c0_0 = arith.constant 0 : index
    %0 = vector.load %arg1[%c0, %c0_0] : memref<256x256xbf16, #tpu.memory_space<vmem>>, vector<256x256xbf16>
    %c0_1 = arith.constant 0 : index
    %c0_2 = arith.constant 0 : index
    %1 = vector.load %arg2[%c0_1, %c0_2] : memref<256x128xbf16, #tpu.memory_space<vmem>>, vector<256x128xbf16>
    %cst = arith.constant dense<0.000000e+00> : vector<256x128xf32>
    %2 = tpu.matmul %0, %1, %cst {dimension_numbers = #tpu.dot_dimension_numbers<[1], [0], [0], [1], [0, 0, 1, 1], [], []>} : vector<256x256xbf16>, vector<256x128xbf16>, vector<256x128xf32> -> vector<256x128xf32>
    %c0_3 = arith.constant 0 : index
    %c0_4 = arith.constant 0 : index
    %3 = vector.load %arg3[%c0_3, %c0_4] : memref<1x128xf32, #tpu.memory_space<vmem>>, vector<1x128xf32>
    %4 = vector.broadcast %3 : vector<1x128xf32> to vector<256x128xf32>
    %5 = arith.addf %2, %4 : vector<256x128xf32>
    %cst_5 = arith.constant 0.000000e+00 : f32
    %6 = vector.broadcast %cst_5 : f32 to vector<256x128xf32>
    %7 = arith.maximumf %5, %6 : vector<256x128xf32>
    %8 = arith.truncf %7 : vector<256x128xf32> to vector<256x128xbf16>
    %c0_6 = arith.constant 0 : index
    %c0_7 = arith.constant 0 : index
    %9 = vector.load %arg4[%c0_6, %c0_7] : memref<256x128xbf16, #tpu.memory_space<vmem>>, vector<256x128xbf16>
    tpu.vector_store %arg4[%c0_6, %c0_7], %8 {strides = array<i32>} : memref<256x128xbf16, #tpu.memory_space<vmem>>, vector<256x128xbf16>,
    return
  }
  func.func @transform_0(%arg0: i32) -> (i32, i32) {
    %c0_i32 = arith.constant 0 : i32
    %c0_i32_0 = arith.constant 0 : i32
    return %arg0, %c0_i32 : i32, i32
  }
  func.func @transform_1(%arg0: i32) -> (i32, i32) {
    %c0_i32 = arith.constant 0 : i32
    %c0_i32_0 = arith.constant 0 : i32
    %c0_i32_1 = arith.constant 0 : i32
    return %c0_i32, %c0_i32_0 : i32, i32
  }
  func.func @transform_2(%arg0: i32) -> (i32, i32) {
    %c0_i32 = arith.constant 0 : i32
    %c0_i32_0 = arith.constant 0 : i32
    %c0_i32_1 = arith.constant 0 : i32
    return %c0_i32, %c0_i32_0 : i32, i32
  }
  func.func @transform_3(%arg0: i32) -> (i32, i32) {
    %c0_i32 = arith.constant 0 : i32
    %c0_i32_0 = arith.constant 0 : i32
    return %arg0, %c0_i32 : i32, i32
  }
}

</mosaic_0001>

<bundles_post_ra>
// kernel: conv_block_forward_nhwc.1
= control target key start
LH: loop header
LB: loop body
LE: loop exit
PB: predicated region body
PF: predicated region fallthrough
CT: control target
= control target key end

     0   :  { %8 = vsyncpa [#allocation3], 0  ;;  %s1719_s0 = inlined_call_operand.vmem [shape: bf16[512,256], index: 0, kind: input, shape index: {}]   ;;  %s1720_s1 = inlined_call_operand.vmem [shape: bf16[256,128], index: 1, kind: input, shape index: {}]   ;;  %s1721_s2 = inlined_call_operand.vmem [shape: f32[1,128], index: 2, kind: input, shape index: {}]   ;;  %s1722_s3 = inlined_call_operand.hbm [shape: bf16[512,128], index: 3, kind: output, shape index: {}]  }
   0x1   :  { %10 = vsyncpa [#allocation3 + $0x1], 0  ;;  %s1475_s12 = smov 0   ;;  %s1477_s13 = smov 0  }
   0x2   :  { %s1479_s14 = smov 0   ;;  %s1481_s15 = smov 0  }
   0x3 LB: > { %s1496_s16 = sadd.s32 4294967295, %s1450_s15   ;;  %s932_s17 = sadd.s32 4294967294, %s1450_s15   ;;  %s1450_s15 = sphi %s1481_s15, %s1728_s15   ;;  %s1446_s14 = sphi %s1479_s14, %s1727_s14   ;;  %s1442_s13 = sphi %s1477_s13, %s1726_s13   ;;  %s1438_s12 = sphi %s1475_s12, %s1725_s12  }
   0x4   : > { %s1500_s18 = sadd.s32 1, %s1450_s15   ;;  %s91_s19 = sadd.s32 1, %s1446_s14 }
   0x5   : > { %s88_s20 = ssub.s32 %s1450_s15, %s1500_s18  ;;  %p101_p0 = scmp.ne.s32.totalorder %s1446_s14, %s1442_s13 }
   0x6   : > { %p89_p1 = scmp.eq.s32.totalorder %s88_s20, 0  ;;  %p102_p2 = scmp.eq.s32.totalorder %s1496_s16, 1 }
   0x7   : > { %p107_p3 = scmp.ne.s32.totalorder %s1442_s13, %s1438_s12  ;;  %p108_p4 = scmp.eq.s32.totalorder %s932_s17, 1 }
   0x8   : > { %s1511_s21 = scalar_select %p89_p1, %s1446_s14, %s91_s19  }
   0x9   : > { %p1513_p5 = por %p102_p2, %p101_p0  ;;  %p1517_p6 = por %p108_p4, %p107_p3 }
   0xa   : > { %p935_p7 = scmp.ge.s32.totalorder %s1450_s15, 1  ;;  %p142_p8 = scmp.lt.s32.totalorder %s1450_s15, 3 }
   0xc   : > { %p143_p9 = pnand %p935_p7, %p142_p8 }
   0xd   : > { %v1324_v0 = vld [vmem:[%s1720_s1 + $0x40] sm:$0xff] (!%p143_p9)   ;;  %s937_s26 = sshll.u32 (!%p143_p9), %s1496_s16, 5  ;;  %v1326_v2 = vld [vmem:[%s1720_s1 + $0x48] sm:$0xff] (!%p143_p9)   ;;  %v1328_v4 = vld [vmem:[%s1720_s1 + $0x50] sm:$0xff] (!%p143_p9)   ;;  %s164_s28 = sand.u32 (!%p143_p9), 1, %s1442_s13  }
   0xe   : > { %146 = sbr.rel (%p143_p9) target bundleno = 341 (0x155), region = 32  ;;  %v1325_v1 = vld [vmem:[%s1720_s1] sm:$0xff] (!%p143_p9)   ;;  %1155 = vmatprep.subr.bf16.mxu0 (!%p143_p9), %v1324_v0  ;;  %1267 = vmatprep.subr.bf16.mxu1 (!%p143_p9), %v1324_v0  ;;  %v1327_v3 = vld [vmem:[%s1720_s1 + $0x8] sm:$0xff] (!%p143_p9)   ;;  %p168_p10 = scmp.lt.s32.totalorder (!%p143_p9), %s937_s26, 63  ;;  %v1329_v5 = vld [vmem:[%s1720_s1 + $0x10] sm:$0xff] (!%p143_p9)  }
   0xf   : > { %1156 = vmatpush3.bf16.msra.mxu0 (!%p143_p9), %v1325_v1  ;;  %1275 = vmatpush3.bf16.msra.mxu1 (!%p143_p9), %v1325_v1  ;;  %v1330_v6 = vld [vmem:[%s1720_s1 + $0x58] sm:$0xff] (!%p143_p9)   ;;  %v1332_v8 = vld [vmem:[%s1720_s1 + $0x60] sm:$0xff] (!%p143_p9)   ;;  %v1334_v10 = vld [vmem:[%s1720_s1 + $0x68] sm:$0xff] (!%p143_p9)   ;;  %s1059_s4 = sshll.u32 (!%p143_p9), %s1496_s16, 11  ;;  %s1678_s16 = scalar_lea.sflag (!%p143_p9), [#allocation3], %s164_s28 }
  0x10   : > { %1157 = vmatprep.subr.bf16.mxu0 (!%p143_p9), %v1326_v2  ;;  %1268 = vmatprep.subr.bf16.mxu1 (!%p143_p9), %v1326_v2  ;;  %v1331_v7 = vld [vmem:[%s1720_s1 + $0x18] sm:$0xff] (!%p143_p9)   ;;  %v1333_v9 = vld [vmem:[%s1720_s1 + $0x20] sm:$0xff] (!%p143_p9)   ;;  %v1335_v13 = vld [vmem:[%s1720_s1 + $0x28] sm:$0xff] (!%p143_p9)   ;;  %s1670_s7 = scalar_lea.hbm (!%p143_p9), %s1722_s3, %s1059_s4  ;;  %s1452_s9 = smov (!%p143_p9), [#allocation2]  }
  0x11   : > { %v1336_v14 = vld [vmem:[%s1720_s1 + $0x70] sm:$0xff] (!%p143_p9)   ;;  %v1338_v16 = vld [vmem:[%s1720_s1 + $0x78] sm:$0xff] (!%p143_p9)   ;;  %v1612_v50 = vld [vmem:[%s1721_s2] ss:$0 sm:$0xff] (!%p143_p9)  ;;  %s1392_s10 = sshll.u32 (!%p143_p9), %s1452_s9, 4  ;;  %s1393_s10 = int_to_ptr.vmem [resolvable:$false] %s1392_s10 }
  0x12   : > { %v1337_v15 = vld [vmem:[%s1720_s1 + $0x30] sm:$0xff] (!%p143_p9)   ;;  %v1339_v17 = vld [vmem:[%s1720_s1 + $0x38] sm:$0xff] (!%p143_p9)   ;;  %s1394_s11 = scalar_lea.vmem (!%p143_p9), %s1393_s10, 4096 }
  0x13   : > { %1158 = vmatpush3.bf16.msra.mxu0 (!%p143_p9), %v1327_v3  ;;  %1276 = vmatpush3.bf16.msra.mxu1 (!%p143_p9), %v1327_v3 }
  0x14   : > { %1159 = vmatprep.subr.bf16.mxu0 (!%p143_p9), %v1328_v4  ;;  %1269 = vmatprep.subr.bf16.mxu1 (!%p143_p9), %v1328_v4 }
  0x15   : > { %s1730_s26 = smov (!%p168_p10, %s937_s26), 63 }
  0x16   : > { %s1026_s20 = sshll.u32 %s1730_s26, 3 }
  0x17   : > { %1160 = vmatpush3.bf16.msra.mxu0 %v1329_v5  ;;  %1277 = vmatpush3.bf16.msra.mxu1 %v1329_v5  ;;  %s1554_s29 = scalar_lea.vmem %s1719_s0, %s1026_s20 }
  0x18   : > { %1161 = vmatprep.subr.bf16.mxu0 %v1330_v6  ;;  %1270 = vmatprep.subr.bf16.mxu1 %v1330_v6  ;;  %v1342_v11 = vld [vmem:[%s1554_s29 + $0x4] ss:$8 sps:$4 sm:$0xff]   ;;  %v1340_v18 = vld [vmem:[%s1554_s29] ss:$8 sps:$4 sm:$0xff]   ;;  %v1346_v20 = vld [vmem:[%s1554_s29 + $0x14] ss:$8 sps:$4 sm:$0xff]  }
  0x19   : > { %v1345_v12 = vld [vmem:[%s1554_s29 + $0x84] ss:$8 sps:$4 sm:$0xff]   ;;  %535 = vmatprep.mubr.bf16.mxu0 %v1342_v11  ;;  %v1343_v19 = vld [vmem:[%s1554_s29 + $0x80] ss:$8 sps:$4 sm:$0xff]   ;;  %v1348_v21 = vld [vmem:[%s1554_s29 + $0x94] ss:$8 sps:$4 sm:$0xff]  }
  0x1a   : > { %599 = vmatprep.mubr.bf16.mxu1 %v1345_v12  ;;  %v1350_v22 = vld [vmem:[%s1554_s29 + $0x10] ss:$8 sps:$4 sm:$0xff]   ;;  %v1352_v24 = vld [vmem:[%s1554_s29 + $0x24] ss:$8 sps:$4 sm:$0xff]   ;;  %v1356_v26 = vld [vmem:[%s1554_s29 + $0x20] ss:$8 sps:$4 sm:$0xff]  }
  0x1b   : > { %1162 = vmatpush3.bf16.msra.mxu0 %v1331_v7  ;;  %1278 = vmatpush3.bf16.msra.mxu1 %v1331_v7  ;;  %v1351_v23 = vld [vmem:[%s1554_s29 + $0x90] ss:$8 sps:$4 sm:$0xff]   ;;  %v1354_v25 = vld [vmem:[%s1554_s29 + $0xa4] ss:$8 sps:$4 sm:$0xff]   ;;  %v1357_v27 = vld [vmem:[%s1554_s29 + $0xa0] ss:$8 sps:$4 sm:$0xff]  }
  0x1c   : > { %1163 = vmatprep.subr.bf16.mxu0 %v1332_v8  ;;  %1271 = vmatprep.subr.bf16.mxu1 %v1332_v8  ;;  %v1358_v28 = vld [vmem:[%s1554_s29 + $0x34] ss:$8 sps:$4 sm:$0xff]   ;;  %v1362_v30 = vld [vmem:[%s1554_s29 + $0x30] ss:$8 sps:$4 sm:$0xff]   ;;  %v1364_v32 = vld [vmem:[%s1554_s29 + $0x44] ss:$8 sps:$4 sm:$0xff]  }
  0x1d   : > { %v1360_v29 = vld [vmem:[%s1554_s29 + $0xb4] ss:$8 sps:$4 sm:$0xff]   ;;  %v1363_v31 = vld [vmem:[%s1554_s29 + $0xb0] ss:$8 sps:$4 sm:$0xff]   ;;  %v1366_v33 = vld [vmem:[%s1554_s29 + $0xc4] ss:$8 sps:$4 sm:$0xff]  }
  0x1e   : > { %v1368_v34 = vld [vmem:[%s1554_s29 + $0x40] ss:$8 sps:$4 sm:$0xff]   ;;  %v1370_v36 = vld [vmem:[%s1554_s29 + $0x54] ss:$8 sps:$4 sm:$0xff]   ;;  %v1374_v38 = vld [vmem:[%s1554_s29 + $0x50] ss:$8 sps:$4 sm:$0xff]  }
  0x1f   : > { %1164 = vmatpush3.bf16.msra.mxu0 %v1333_v9  ;;  %1279 = vmatpush3.bf16.msra.mxu1 %v1333_v9  ;;  %v1369_v35 = vld [vmem:[%s1554_s29 + $0xc0] ss:$8 sps:$4 sm:$0xff]   ;;  %v1372_v37 = vld [vmem:[%s1554_s29 + $0xd4] ss:$8 sps:$4 sm:$0xff]   ;;  %v1375_v39 = vld [vmem:[%s1554_s29 + $0xd0] ss:$8 sps:$4 sm:$0xff]  }
  0x20   : > { %1165 = vmatprep.subr.bf16.mxu0 %v1334_v10  ;;  %1272 = vmatprep.subr.bf16.mxu1 %v1334_v10  ;;  %v1376_v40 = vld [vmem:[%s1554_s29 + $0x64] ss:$8 sps:$4 sm:$0xff]   ;;  %v1380_v42 = vld [vmem:[%s1554_s29 + $0x60] ss:$8 sps:$4 sm:$0xff]   ;;  %v1382_v44 = vld [vmem:[%s1554_s29 + $0x74] ss:$8 sps:$4 sm:$0xff]  }
  0x21   : > { %v1378_v41 = vld [vmem:[%s1554_s29 + $0xe4] ss:$8 sps:$4 sm:$0xff]   ;;  %v1381_v43 = vld [vmem:[%s1554_s29 + $0xe0] ss:$8 sps:$4 sm:$0xff]   ;;  %v1384_v45 = vld [vmem:[%s1554_s29 + $0xf4] ss:$8 sps:$4 sm:$0xff]  }
  0x22   : > { %v1386_v46 = vld [vmem:[%s1554_s29 + $0x70] ss:$8 sps:$4 sm:$0xff]  }
  0x23   : > { %1166 = vmatpush3.bf16.msra.mxu0 %v1335_v13  ;;  %1280 = vmatpush3.bf16.msra.mxu1 %v1335_v13  ;;  %v1387_v47 = vld [vmem:[%s1554_s29 + $0xf0] ss:$8 sps:$4 sm:$0xff]   ;;  %s936_s29 = sshll.u32 %s164_s28, 7 }
  0x24   : > { %1167 = vmatprep.subr.bf16.mxu0 %v1336_v14  ;;  %1273 = vmatprep.subr.bf16.mxu1 %v1336_v14  ;;  %s1621_s30 = scalar_lea.vmem [#allocation2], %s936_s29 }
  0x25   : > { %s870_s26 = sshll.u32 %s1621_s30, 4  ;;  %s1672_s26 = int_to_ptr.vmem [resolvable:$true] %s870_s26 }
  0x26   : > { %s1388_s8 = scalar_lea.vmem %s1672_s26, 2048  ;;  %p1395_p0 = scmp.lt.s32.totalorder %s1672_s26, %s1393_s10 }
  0x27   : > { %1168 = vmatpush3.bf16.msra.mxu0 %v1337_v15  ;;  %1281 = vmatpush3.bf16.msra.mxu1 %v1337_v15  ;;  %p1389_p11 = scmp.ne.s32.totalorder %s1672_s26, %s1388_s8  ;;  %p1396_p1 = scmp.lt.s32.totalorder %s1394_s11, %s1388_s8 }
  0x28   : > { %1169 = vmatprep.subr.bf16.mxu0 %v1338_v16  ;;  %1274 = vmatprep.subr.bf16.mxu1 %v1338_v16 }
  0x29   : > { %p1390_p12 = pnand %p1389_p11, %p1513_p5  ;;  %p1397_p2 = por %p1396_p1, %p1395_p0 }
  0x2b   : > { %1170 = vmatpush3.bf16.msra.mxu0 %v1339_v17  ;;  %1282 = vmatpush3.bf16.msra.mxu1 %v1339_v17  ;;  %p1391_p13 = pneg %p1390_p12 }
  0x2d   : > { %p1398_p3 = pnand %p1397_p2, %p1391_p13 }
  0x2e   : > { %536 = vmatmul.mubr.bf16.vlgmr.msra.gmra.mrb[0].mxu0 %v1340_v18  ;;  %600 = vmatmul.mubr.bf16.vlgmr.msra.gmra.mrb[0].mxu1 %v1343_v19 }
  0x2f   : > { %543 = vmatprep.mubr.bf16.mxu0 %v1346_v20  ;;  %607 = vmatprep.mubr.bf16.mxu1 %v1348_v21 }
  0x36   : > { %544 = vmatmul.mubr.bf16.gmra.mrb[4].mxu0 %v1350_v22  ;;  %608 = vmatmul.mubr.bf16.gmra.mrb[4].mxu1 %v1351_v23 }
  0x37   : > { %551 = vmatprep.mubr.bf16.mxu0 %v1352_v24  ;;  %615 = vmatprep.mubr.bf16.mxu1 %v1354_v25 }
  0x3e   : > { %552 = vmatmul.mubr.bf16.gmra.mrb[8].mxu0 %v1356_v26  ;;  %616 = vmatmul.mubr.bf16.gmra.mrb[8].mxu1 %v1357_v27 }
  0x3f   : > { %559 = vmatprep.mubr.bf16.mxu0 %v1358_v28  ;;  %623 = vmatprep.mubr.bf16.mxu1 %v1360_v29 }
  0x46   : > { %560 = vmatmul.mubr.bf16.gmra.mrb[12].mxu0 %v1362_v30  ;;  %624 = vmatmul.mubr.bf16.gmra.mrb[12].mxu1 %v1363_v31 }
  0x47   : > { %567 = vmatprep.mubr.bf16.mxu0 %v1364_v32  ;;  %631 = vmatprep.mubr.bf16.mxu1 %v1366_v33 }
  0x4e   : > { %568 = vmatmul.mubr.bf16.gmra.mrb[16].mxu0 %v1368_v34  ;;  %632 = vmatmul.mubr.bf16.gmra.mrb[16].mxu1 %v1369_v35 }
  0x4f   : > { %575 = vmatprep.mubr.bf16.mxu0 %v1370_v36  ;;  %639 = vmatprep.mubr.bf16.mxu1 %v1372_v37 }
  0x56   : > { %576 = vmatmul.mubr.bf16.gmra.mrb[20].mxu0 %v1374_v38  ;;  %640 = vmatmul.mubr.bf16.gmra.mrb[20].mxu1 %v1375_v39 }
  0x57   : > { %583 = vmatprep.mubr.bf16.mxu0 %v1376_v40  ;;  %647 = vmatprep.mubr.bf16.mxu1 %v1378_v41 }
  0x5e   : > { %584 = vmatmul.mubr.bf16.gmra.mrb[24].mxu0 %v1380_v42  ;;  %648 = vmatmul.mubr.bf16.gmra.mrb[24].mxu1 %v1381_v43 }
  0x5f   : > { %591 = vmatprep.mubr.bf16.mxu0 %v1382_v44  ;;  %655 = vmatprep.mubr.bf16.mxu1 %v1384_v45 }
  0x66   : > { %592 = vmatmul.mubr.bf16.gmra.mrb[28].mxu0 %v1386_v46  ;;  %656 = vmatmul.mubr.bf16.gmra.mrb[28].mxu1 %v1387_v47 }
 0x101   : > { %v1171_v48 = vpop.f32.mrb[0].mxu0  ;;  %v1219_v49 = vpop.f32.mrb[0].mxu1 }
 0x102   : > { %v1172_v51 = vpop.f32.mrb[1].mxu0  ;;  %v1220_v52 = vpop.f32.mrb[1].mxu1 }
 0x103   : > { %v1173_v53 = vadd.f32 %v1172_v51, %v1171_v48  ;;  %v1221_v54 = vadd.f32 %v1220_v52, %v1219_v49  ;;  %v1174_v55 = vpop.f32.mrb[2].mxu0  ;;  %v1222_v56 = vpop.f32.mrb[2].mxu1 }
 0x104   : > { %v1175_v57 = vpop.f32.mrb[3].mxu0  ;;  %v1223_v58 = vpop.f32.mrb[3].mxu1 }
 0x105   : > { %v538_v59 = vadd.f32 %v1173_v53, %v1612_v50  ;;  %v602_v60 = vadd.f32 %v1221_v54, %v1612_v50  ;;  %v1176_v61 = vadd.f32 %v1175_v57, %v1174_v55  ;;  %v1224_v62 = vadd.f32 %v1223_v58, %v1222_v56 }
 0x107   : > { %v541_v63 = vadd.f32 %v1176_v61, %v1612_v50  ;;  %v605_v0 = vadd.f32 %v1224_v62, %v1612_v50  ;;  %v664_v1 = vmax.f32 %v538_v59, 0.0  ;;  %v680_v2 = vmax.f32 %v602_v60, 0.0 }
 0x109   : > { %v665_v3 = vmax.f32 %v541_v63, 0.0  ;;  %v681_v4 = vmax.f32 %v605_v0, 0.0  ;;  %v1177_v5 = vpop.f32.mrb[4].mxu0  ;;  %v1225_v6 = vpop.f32.mrb[4].mxu1 }
 0x10a   : > { %v1178_v7 = vpop.f32.mrb[5].mxu0  ;;  %v1226_v8 = vpop.f32.mrb[5].mxu1 }
 0x10b   : > { %v1063_v9 = vpack.c.bf16 %v665_v3, %v664_v1  ;;  %v1103_v10 = vpack.c.bf16 %v681_v4, %v680_v2  ;;  %v1179_v11 = vadd.f32 %v1178_v7, %v1177_v5  ;;  %v1227_v12 = vadd.f32 %v1226_v8, %v1225_v6  ;;  %v1180_v13 = vpop.f32.mrb[6].mxu0  ;;  %v1228_v14 = vpop.f32.mrb[6].mxu1 }
 0x10c   : > { %v1181_v15 = vpop.f32.mrb[7].mxu0  ;;  %v1229_v16 = vpop.f32.mrb[7].mxu1 }
 0x10d   : > { %1064 = vst [vmem:[%s1621_s30] sm:$0xff] %v1063_v9   ;;  %1147 = vst [vmem:[%s1621_s30 + $0x40] sm:$0xff] %v1103_v10   ;;  %v546_v17 = vadd.f32 %v1179_v11, %v1612_v50  ;;  %v610_v18 = vadd.f32 %v1227_v12, %v1612_v50  ;;  %v1182_v19 = vadd.f32 %v1181_v15, %v1180_v13 }
 0x10e   : > { %v1230_v20 = vadd.f32 %v1229_v16, %v1228_v14 }
 0x10f   : > { %v549_v21 = vadd.f32 %v1182_v19, %v1612_v50  ;;  %v666_v23 = vmax.f32 %v546_v17, 0.0  ;;  %v682_v24 = vmax.f32 %v610_v18, 0.0 }
 0x110   : > { %v613_v22 = vadd.f32 %v1230_v20, %v1612_v50 }
 0x111   : > { %v667_v25 = vmax.f32 %v549_v21, 0.0  ;;  %v1183_v27 = vpop.f32.mrb[8].mxu0  ;;  %v1231_v28 = vpop.f32.mrb[8].mxu1 }
 0x112   : > { %v683_v26 = vmax.f32 %v613_v22, 0.0  ;;  %v1184_v29 = vpop.f32.mrb[9].mxu0  ;;  %v1232_v30 = vpop.f32.mrb[9].mxu1 }
 0x113   : > { %v1068_v31 = vpack.c.bf16 %v667_v25, %v666_v23  ;;  %v1185_v33 = vadd.f32 %v1184_v29, %v1183_v27  ;;  %v1233_v34 = vadd.f32 %v1232_v30, %v1231_v28  ;;  %v1186_v35 = vpop.f32.mrb[10].mxu0  ;;  %v1234_v36 = vpop.f32.mrb[10].mxu1 }
 0x114   : > { %v1108_v32 = vpack.c.bf16 %v683_v26, %v682_v24  ;;  %v1187_v37 = vpop.f32.mrb[11].mxu0  ;;  %v1235_v38 = vpop.f32.mrb[11].mxu1 }
 0x115   : > { %1140 = vst [vmem:[%s1621_s30 + $0x8] sm:$0xff] %v1068_v31   ;;  %v554_v39 = vadd.f32 %v1185_v33, %v1612_v50  ;;  %v618_v40 = vadd.f32 %v1233_v34, %v1612_v50  ;;  %v1188_v41 = vadd.f32 %v1187_v37, %v1186_v35  ;;  %v1236_v42 = vadd.f32 %v1235_v38, %v1234_v36 }
 0x116   : > { %1148 = vst [vmem:[%s1621_s30 + $0x48] sm:$0xff] %v1108_v32  }
 0x117   : > { %v557_v43 = vadd.f32 %v1188_v41, %v1612_v50  ;;  %v621_v44 = vadd.f32 %v1236_v42, %v1612_v50  ;;  %v668_v45 = vmax.f32 %v554_v39, 0.0  ;;  %v684_v46 = vmax.f32 %v618_v40, 0.0 }
 0x119   : > { %v669_v47 = vmax.f32 %v557_v43, 0.0  ;;  %v685_v48 = vmax.f32 %v621_v44, 0.0  ;;  %v1189_v49 = vpop.f32.mrb[12].mxu0  ;;  %v1237_v51 = vpop.f32.mrb[12].mxu1 }
 0x11a   : > { %v1190_v52 = vpop.f32.mrb[13].mxu0  ;;  %v1238_v53 = vpop.f32.mrb[13].mxu1 }
 0x11b   : > { %v1073_v54 = vpack.c.bf16 %v669_v47, %v668_v45  ;;  %v1113_v55 = vpack.c.bf16 %v685_v48, %v684_v46  ;;  %v1191_v56 = vadd.f32 %v1190_v52, %v1189_v49  ;;  %v1239_v57 = vadd.f32 %v1238_v53, %v1237_v51  ;;  %v1192_v58 = vpop.f32.mrb[14].mxu0  ;;  %v1240_v59 = vpop.f32.mrb[14].mxu1 }
 0x11c   : > { %v1193_v60 = vpop.f32.mrb[15].mxu0  ;;  %v1241_v61 = vpop.f32.mrb[15].mxu1 }
 0x11d   : > { %1141 = vst [vmem:[%s1621_s30 + $0x10] sm:$0xff] %v1073_v54   ;;  %1149 = vst [vmem:[%s1621_s30 + $0x50] sm:$0xff] %v1113_v55   ;;  %v562_v62 = vadd.f32 %v1191_v56, %v1612_v50  ;;  %v626_v63 = vadd.f32 %v1239_v57, %v1612_v50  ;;  %v1194_v0 = vadd.f32 %v1193_v60, %v1192_v58 }
 0x11e   : > { %v1242_v1 = vadd.f32 %v1241_v61, %v1240_v59 }
 0x11f   : > { %v565_v2 = vadd.f32 %v1194_v0, %v1612_v50  ;;  %v670_v4 = vmax.f32 %v562_v62, 0.0  ;;  %v686_v5 = vmax.f32 %v626_v63, 0.0 }
 0x120   : > { %v629_v3 = vadd.f32 %v1242_v1, %v1612_v50 }
 0x121   : > { %v671_v6 = vmax.f32 %v565_v2, 0.0  ;;  %v1195_v8 = vpop.f32.mrb[16].mxu0  ;;  %v1243_v9 = vpop.f32.mrb[16].mxu1 }
 0x122   : > { %v687_v7 = vmax.f32 %v629_v3, 0.0  ;;  %v1196_v10 = vpop.f32.mrb[17].mxu0  ;;  %v1244_v11 = vpop.f32.mrb[17].mxu1 }
 0x123   : > { %v1078_v12 = vpack.c.bf16 %v671_v6, %v670_v4  ;;  %v1197_v14 = vadd.f32 %v1196_v10, %v1195_v8  ;;  %v1245_v15 = vadd.f32 %v1244_v11, %v1243_v9  ;;  %v1198_v16 = vpop.f32.mrb[18].mxu0  ;;  %v1246_v17 = vpop.f32.mrb[18].mxu1 }
 0x124   : > { %v1118_v13 = vpack.c.bf16 %v687_v7, %v686_v5  ;;  %v1199_v18 = vpop.f32.mrb[19].mxu0  ;;  %v1247_v19 = vpop.f32.mrb[19].mxu1 }
 0x125   : > { %1142 = vst [vmem:[%s1621_s30 + $0x18] sm:$0xff] %v1078_v12   ;;  %v570_v20 = vadd.f32 %v1197_v14, %v1612_v50  ;;  %v634_v21 = vadd.f32 %v1245_v15, %v1612_v50  ;;  %v1200_v22 = vadd.f32 %v1199_v18, %v1198_v16  ;;  %v1248_v23 = vadd.f32 %v1247_v19, %v1246_v17 }
 0x126   : > { %1150 = vst [vmem:[%s1621_s30 + $0x58] sm:$0xff] %v1118_v13  }
 0x127   : > { %v573_v24 = vadd.f32 %v1200_v22, %v1612_v50  ;;  %v637_v25 = vadd.f32 %v1248_v23, %v1612_v50  ;;  %v672_v26 = vmax.f32 %v570_v20, 0.0  ;;  %v688_v27 = vmax.f32 %v634_v21, 0.0 }
 0x129   : > { %v673_v28 = vmax.f32 %v573_v24, 0.0  ;;  %v689_v29 = vmax.f32 %v637_v25, 0.0  ;;  %v1201_v30 = vpop.f32.mrb[20].mxu0  ;;  %v1249_v31 = vpop.f32.mrb[20].mxu1 }
 0x12a   : > { %v1202_v32 = vpop.f32.mrb[21].mxu0  ;;  %v1250_v33 = vpop.f32.mrb[21].mxu1 }
 0x12b   : > { %v1083_v34 = vpack.c.bf16 %v673_v28, %v672_v26  ;;  %v1123_v35 = vpack.c.bf16 %v689_v29, %v688_v27  ;;  %v1203_v36 = vadd.f32 %v1202_v32, %v1201_v30  ;;  %v1251_v37 = vadd.f32 %v1250_v33, %v1249_v31  ;;  %v1204_v38 = vpop.f32.mrb[22].mxu0  ;;  %v1252_v39 = vpop.f32.mrb[22].mxu1 }
 0x12c   : > { %v1205_v40 = vpop.f32.mrb[23].mxu0  ;;  %v1253_v41 = vpop.f32.mrb[23].mxu1 }
 0x12d   : > { %1143 = vst [vmem:[%s1621_s30 + $0x20] sm:$0xff] %v1083_v34   ;;  %1151 = vst [vmem:[%s1621_s30 + $0x60] sm:$0xff] %v1123_v35   ;;  %v578_v42 = vadd.f32 %v1203_v36, %v1612_v50  ;;  %v642_v43 = vadd.f32 %v1251_v37, %v1612_v50  ;;  %v1206_v44 = vadd.f32 %v1205_v40, %v1204_v38 }
 0x12e   : > { %v1254_v45 = vadd.f32 %v1253_v41, %v1252_v39 }
 0x12f   : > { %v581_v46 = vadd.f32 %v1206_v44, %v1612_v50  ;;  %v674_v48 = vmax.f32 %v578_v42, 0.0  ;;  %v690_v49 = vmax.f32 %v642_v43, 0.0 }
 0x130   : > { %v645_v47 = vadd.f32 %v1254_v45, %v1612_v50 }
 0x131   : > { %v675_v51 = vmax.f32 %v581_v46, 0.0  ;;  %v1207_v53 = vpop.f32.mrb[24].mxu0  ;;  %v1255_v54 = vpop.f32.mrb[24].mxu1 }
 0x132   : > { %v691_v52 = vmax.f32 %v645_v47, 0.0  ;;  %v1208_v55 = vpop.f32.mrb[25].mxu0  ;;  %v1256_v56 = vpop.f32.mrb[25].mxu1 }
 0x133   : > { %v1088_v57 = vpack.c.bf16 %v675_v51, %v674_v48  ;;  %v1209_v59 = vadd.f32 %v1208_v55, %v1207_v53  ;;  %v1257_v60 = vadd.f32 %v1256_v56, %v1255_v54  ;;  %v1210_v61 = vpop.f32.mrb[26].mxu0  ;;  %v1258_v62 = vpop.f32.mrb[26].mxu1 }
 0x134   : > { %v1128_v58 = vpack.c.bf16 %v691_v52, %v690_v49  ;;  %v1211_v63 = vpop.f32.mrb[27].mxu0  ;;  %v1259_v0 = vpop.f32.mrb[27].mxu1 }
 0x135   : > { %1144 = vst [vmem:[%s1621_s30 + $0x28] sm:$0xff] %v1088_v57   ;;  %v586_v1 = vadd.f32 %v1209_v59, %v1612_v50  ;;  %v650_v2 = vadd.f32 %v1257_v60, %v1612_v50  ;;  %v1212_v3 = vadd.f32 %v1211_v63, %v1210_v61  ;;  %v1260_v4 = vadd.f32 %v1259_v0, %v1258_v62 }
 0x136   : > { %1152 = vst [vmem:[%s1621_s30 + $0x68] sm:$0xff] %v1128_v58  }
 0x137   : > { %v589_v5 = vadd.f32 %v1212_v3, %v1612_v50  ;;  %v653_v6 = vadd.f32 %v1260_v4, %v1612_v50  ;;  %v676_v7 = vmax.f32 %v586_v1, 0.0  ;;  %v692_v8 = vmax.f32 %v650_v2, 0.0 }
 0x139   : > { %v677_v9 = vmax.f32 %v589_v5, 0.0  ;;  %v693_v10 = vmax.f32 %v653_v6, 0.0  ;;  %v1213_v11 = vpop.f32.mrb[28].mxu0  ;;  %v1261_v12 = vpop.f32.mrb[28].mxu1 }
 0x13a   : > { %v1214_v13 = vpop.f32.mrb[29].mxu0  ;;  %v1262_v14 = vpop.f32.mrb[29].mxu1 }
 0x13b   : > { %v1093_v15 = vpack.c.bf16 %v677_v9, %v676_v7  ;;  %v1133_v16 = vpack.c.bf16 %v693_v10, %v692_v8  ;;  %v1215_v17 = vadd.f32 %v1214_v13, %v1213_v11  ;;  %v1263_v18 = vadd.f32 %v1262_v14, %v1261_v12  ;;  %v1216_v19 = vpop.f32.mrb[30].mxu0  ;;  %v1264_v20 = vpop.f32.mrb[30].mxu1 }
 0x13c   : > { %v1217_v21 = vpop.f32.mrb[31].mxu0  ;;  %v1265_v22 = vpop.f32.mrb[31].mxu1 }
 0x13d   : > { %1145 = vst [vmem:[%s1621_s30 + $0x30] sm:$0xff] %v1093_v15   ;;  %1153 = vst [vmem:[%s1621_s30 + $0x70] sm:$0xff] %v1133_v16   ;;  %v594_v23 = vadd.f32 %v1215_v17, %v1612_v50  ;;  %v658_v24 = vadd.f32 %v1263_v18, %v1612_v50  ;;  %v1218_v25 = vadd.f32 %v1217_v21, %v1216_v19 }
 0x13e   : > { %v1266_v26 = vadd.f32 %v1265_v22, %v1264_v20 }
 0x13f   : > { %v597_v27 = vadd.f32 %v1218_v25, %v1612_v50  ;;  %v678_v29 = vmax.f32 %v594_v23, 0.0  ;;  %v694_v30 = vmax.f32 %v658_v24, 0.0 }
 0x140   : > { %v661_v28 = vadd.f32 %v1266_v26, %v1612_v50 }
 0x141   : > { %v679_v31 = vmax.f32 %v597_v27, 0.0 }
 0x142   : > { %v695_v32 = vmax.f32 %v661_v28, 0.0 }
 0x143   : > { %v1098_v33 = vpack.c.bf16 %v679_v31, %v678_v29 }
 0x144   : > { %v1138_v34 = vpack.c.bf16 %v695_v32, %v694_v30 }
 0x145   : > { %1146 = vst [vmem:[%s1621_s30 + $0x38] sm:$0xff] %v1098_v33  }
 0x146   : > { %1154 = vst [vmem:[%s1621_s30 + $0x78] sm:$0xff] %v1138_v34  }
 0x147   : > { %1401 = shalt.err (!%p1398_p3)
}
 0x148   : > { %s1402_s17 = scalar_lea.hbm %s1670_s7, 2048  ;;  %s1406_s24 = scalar_lea.hbm %s1722_s3, 4096 }
 0x149   : > { %p1403_p4 = scmp.ne.s32.totalorder %s1670_s7, %s1402_s17  ;;  %p1407_p9 = scmp.lt.u32.totalorder %s1670_s7, %s1722_s3 }
 0x14a   : > { %p1408_p10 = scmp.lt.u32.totalorder %s1406_s24, %s1402_s17  ;;  %p1410_p12 = scmp.lt.u32.totalorder %s1402_s17, %s1670_s7 }
 0x14b   : > { %p1404_p7 = pnand %p1403_p4, %p1513_p5 }
 0x14c   : > { %p1409_p11 = por %p1408_p10, %p1407_p9 }
 0x14d   : > { %p1405_p8 = pneg %p1404_p7 }
 0x14e   : > { %p1411_p13 = por %p1410_p12, %p1409_p11 }
 0x150   : > { %p1412_p0 = pnand %p1411_p13, %p1405_p8 }
 0x152   : > { %1415 = shalt.err (!%p1412_p0)
}
 0x153   : > { %s1453_s28 = smov 64   ;;  %s1454_s29 = smov 4  }
 0x154   : > { %1283 = dma.vmem_to_hbm [thread:$0]  (%p1513_p5), %s1672_s26, 2048, %s1670_s7, %s1678_s16, %s1453_s28, %s1453_s28, %s1454_s29  }
 0x155 PF: > { %p1289_p1 = scmp.ge.s32.totalorder %s1450_s15, 2  ;;  %s885_s30 = sand.u32 1, %s1438_s12  }
 0x156   : > { %s886_s4 = scalar_lea.sflag [#allocation3], %s885_s30 }
 0x157   : > { %p1286_p2 = pnand %p1289_p1, %p1517_p6 }
 0x159   : > { %1433 = dma.done.wait (!%p1286_p2), %s886_s4, 2048  }
 0x15a   : > { %1435 = vsyncadd (!%p1286_p2), %s886_s4, 4294965248  ;;  %p13_p3 = scmp.ge.s32.totalorder %s1500_s18, 4   ;;  %s1725_s12 = smov %s1442_s13 }
 0x15b   : > { %s1726_s13 = smov %s1446_s14  ;;  %s1727_s14 = smov %s1511_s21 }
 0x15c   : > { %s1728_s15 = smov %s1500_s18  ;;  %15 = sbr.rel (!%p13_p3) target bundleno = 3 (0x3), region = 67 }
 0x163   :  { %891 = vsyncpa [#allocation3], 1 }
 0x164   :  { %893 = vsyncpa [#allocation3 + $0x1], 1 }

</bundles_post_ra>
